<compile_context>
chip_gen: v6e
topology: v6e:2x2x1
jax: 0.10.0
libtpu: 0.0.40
codegen_flags: <defaults>
</compile_context>

<pallas_src>
import functools

import jax
import jax.numpy as jnp
from jax.experimental import pallas as pl
from jax.experimental.pallas import tpu as pltpu


def _round_up(x, m):
    return (x + m - 1) // m * m


def rnn_head_kernel(tok_ref, pack_ref, o_ref, *, T, Bp, V_pad, H, O):
    """Fused embedding lookup + Elman-RNN recurrence + Linear head + softmax.

    tok_ref  : (T*Bp, 1) int32  time-major flat token ids (row = t*Bp + b; padded
                                batch rows carry token 0)
    pack_ref : (V_pad + 2*H + Bp, H) f32  packed constants:
                 rows [0, V_pad)              W_fused = emb_table @ W_ih^T (pad rows 0)
                 rows [V_pad, V_pad+H)        W_hh^T
                 rows [V_pad+H, V_pad+2H)     W_out^T, columns >= O zero-padded
                 rows [V_pad+2H, V_pad+2H+Bp) bias replicated over Bp rows, cols >= O zero
    o_ref    : (Bp, O) f32  softmax probabilities (padded batch rows are junk)
    """
    TB = T * Bp

    # ---- Single-DMA packed constants; all static, 8-sublane-aligned slices.
    w_fused = pack_ref[pl.ds(0, V_pad), :]                     # (V_pad, H)
    w_hh    = pack_ref[pl.ds(V_pad, H), :]                     # (H, H)
    w_out   = pack_ref[pl.ds(V_pad + H, H), :]                 # (H, H), cols >= O are 0
    bias    = pack_ref[pl.ds(V_pad + 2 * H, Bp), :]            # (Bp, H), cols >= O are 0

    # ---- Fused embedding gather + input projection (one one-hot MXU matmul),
    #      hoisted out of the serial recurrence. Lives in vregs (no VMEM scratch).
    toks = tok_ref[...]                                                # (T*Bp, 1)
    iota_v = jax.lax.broadcasted_iota(jnp.int32, (TB, V_pad), 1)
    onehot = (iota_v == toks).astype(jnp.float32)                      # (T*Bp, V_pad)
    xproj = jnp.dot(onehot, w_fused,
                    preferred_element_type=jnp.float32)                # (T*Bp, H)

    # ---- Serial recurrence (tanh, bias=False), fully unrolled; only the dependent
    #      h @ W_hh^T + tanh is left on the critical path.
    h = jnp.zeros((Bp, H), jnp.float32)
    for t in range(T):
        x_t = xproj[t * Bp:(t + 1) * Bp, :]                            # aligned static slice
        h = jnp.tanh(x_t + jnp.dot(h, w_hh,
                                   preferred_element_type=jnp.float32))

    # ---- Linear head + softmax over classes (torch.softmax(x, dim=1)).
    logits_full = jnp.dot(h, w_out, preferred_element_type=jnp.float32) + bias  # (Bp, H)
    logits = logits_full[:, :O]                                        # (Bp, O)
    m = jnp.max(logits, axis=-1, keepdims=True)
    e = jnp.exp(logits - m)
    denom = jnp.sum(e, axis=-1, keepdims=True)
    o_ref[...] = (e / denom).astype(o_ref.dtype)                       # exact divide


def init_params(key, dict_len, str_dim, hidden_size, output_size):
    k1, k2, k3, k4, k5 = jax.random.split(key, 5)
    emb = jax.random.normal(k1, (dict_len, str_dim), jnp.float32) * 0.1
    emb = emb.at[0].set(0.0)  # padding_idx=0
    w_ih = jax.random.normal(k2, (hidden_size, str_dim), jnp.float32) * 0.1    # torch: (H, D)
    w_hh = jax.random.normal(k3, (hidden_size, hidden_size), jnp.float32) * 0.1
    w_out = jax.random.normal(k4, (output_size, hidden_size), jnp.float32) * 0.1
    b_out = jax.random.normal(k5, (output_size,), jnp.float32) * 0.1
    return dict(emb=emb, w_ih=w_ih, w_hh=w_hh, w_out=w_out, b_out=b_out)


def prepare_packed_params(params, batch_pad=8):
    """One-time packing of all constant operands into a single contiguous slab."""
    emb, w_ih = params["emb"], params["w_ih"]
    w_hh, w_out, b_out = params["w_hh"], params["w_out"], params["b_out"]
    V, _ = emb.shape
    H = w_hh.shape[0]
    O = w_out.shape[0]
    V_pad = _round_up(V, 8)

    # Algebraic fusion of embedding + input projection (row 0 stays zero).
    w_fused = jnp.zeros((V_pad, H), jnp.float32).at[:V, :].set(
        (emb @ w_ih.T).astype(jnp.float32))
    w_hh_t = w_hh.T.astype(jnp.float32)                                   # (H, H)
    w_out_t = jnp.zeros((H, H), jnp.float32).at[:, :O].set(
        w_out.T.astype(jnp.float32))                                      # col-padded
    bias_blk = jnp.zeros((batch_pad, H), jnp.float32).at[:, :O].set(
        jnp.broadcast_to(b_out.astype(jnp.float32), (batch_pad, O)))      # replicated

    packed = jnp.concatenate([w_fused, w_hh_t, w_out_t, bias_blk], axis=0)
    meta = dict(V_pad=V_pad, H=H, O=O, Bp=batch_pad)
    return packed, meta


def torch_model_forward(x_tokens, packed, meta):
    """Inference path of TorchModel.forward (y=None): returns softmax probs (B, O)."""
    B, T = x_tokens.shape
    Bp, H, O, V_pad = meta["Bp"], meta["H"], meta["O"], meta["V_pad"]
    assert B <= Bp, "toy kernel handles a single 8-row batch tile"

    # Only per-call glue: pad batch to the sublane granule and flatten time-major
    # (T*Bp*4 = 256 bytes of token ids). Padded rows use token 0 (padding row).
    toks = jnp.zeros((Bp, T), jnp.int32).at[:B, :].set(x_tokens.astype(jnp.int32))
    toks_tm = jnp.transpose(toks).reshape(T * Bp, 1)

    vmem = pl.BlockSpec(memory_space=pltpu.MemorySpace.VMEM)
    kernel = functools.partial(rnn_head_kernel, T=T, Bp=Bp, V_pad=V_pad, H=H, O=O)
    out = pl.pallas_call(
        kernel,
        out_shape=jax.ShapeDtypeStruct((Bp, O), jnp.float32),
        in_specs=[vmem, vmem],
        out_specs=vmem,
    )(toks_tm, packed)
    return out[:B]


def reference_forward(x_tokens, params):
    emb = params["emb"][x_tokens]           # (B, T, D)
    B, T, _ = emb.shape
    H = params["w_hh"].shape[0]
    h = jnp.zeros((B, H), jnp.float32)
    for t in range(T):
        h = jnp.tanh(emb[:, t, :] @ params["w_ih"].T + h @ params["w_hh"].T)
    logits = h @ params["w_out"].T + params["b_out"]
    return jax.nn.softmax(logits, axis=1)


if __name__ == "__main__":
    # Small shapes consistent with the module: x is (batch, seq_len) of token ids.
    dict_len, str_dim, hidden_size, output_size = 30, 32, 32, 8
    batch, seq_len = 2, 8

    key = jax.random.PRNGKey(0)
    kp, kx = jax.random.split(key)
    params = init_params(kp, dict_len, str_dim, hidden_size, output_size)
    packed, meta = prepare_packed_params(params)
    x = jax.random.randint(kx, (batch, seq_len), 0, dict_len, dtype=jnp.int32)

    y_pred = jax.block_until_ready(torch_model_forward(x, packed, meta))
    y_ref = reference_forward(x, params)

    assert y_pred.shape == (batch, output_size)
    assert jnp.allclose(y_pred, y_ref, atol=1e-4), "mismatch vs pure-JAX reference"
    assert jnp.allclose(jnp.sum(y_pred, axis=1), 1.0, atol=1e-4)

    print("KERNEL_OK")
</pallas_src>

<mosaic_0001>
module attributes {stable_mosaic.version = 11 : i64} {
  func.func @rnn_head_kernel(%arg0: memref<64x1xi32, #tpu.memory_space<vmem>>, %arg1: memref<104x32xf32, #tpu.memory_space<vmem>>, %arg2: memref<8x8xf32, #tpu.memory_space<vmem>>) attributes {dimension_semantics = [], scalar_prefetch = 0 : i64, scratch_operands = 0 : i64, tpu.core_type = #tpu.core_type<tc>} {
    %c0 = arith.constant 0 : index
    %c0_0 = arith.constant 0 : index
    %0 = vector.load %arg1[%c0, %c0_0] : memref<104x32xf32, #tpu.memory_space<vmem>>, vector<32x32xf32>
    %c32 = arith.constant 32 : index
    %c0_1 = arith.constant 0 : index
    %1 = vector.load %arg1[%c32, %c0_1] : memref<104x32xf32, #tpu.memory_space<vmem>>, vector<32x32xf32>
    %c64 = arith.constant 64 : index
    %c0_2 = arith.constant 0 : index
    %2 = vector.load %arg1[%c64, %c0_2] : memref<104x32xf32, #tpu.memory_space<vmem>>, vector<32x32xf32>
    %c96 = arith.constant 96 : index
    %c0_3 = arith.constant 0 : index
    %3 = vector.load %arg1[%c96, %c0_3] : memref<104x32xf32, #tpu.memory_space<vmem>>, vector<8x32xf32>
    %c0_4 = arith.constant 0 : index
    %c0_5 = arith.constant 0 : index
    %4 = vector.load %arg0[%c0_4, %c0_5] : memref<64x1xi32, #tpu.memory_space<vmem>>, vector<64x1xi32>
    %5 = tpu.iota {dimensions = array<i32: 1>} : vector<64x32xi32>
    %6 = vector.broadcast %4 : vector<64x1xi32> to vector<64x32xi32>
    %7 = arith.cmpi eq, %5, %6 : vector<64x32xi32>
    %8 = arith.extui %7 : vector<64x32xi1> to vector<64x32xi32>
    %9 = arith.sitofp %8 : vector<64x32xi32> to vector<64x32xf32>
    %cst = arith.constant dense<0.000000e+00> : vector<64x32xf32>
    %10 = tpu.matmul %9, %0, %cst {dimension_numbers = #tpu.dot_dimension_numbers<[1], [0], [0], [1], [0, 0, 1, 1], [], []>} : vector<64x32xf32>, vector<32x32xf32>, vector<64x32xf32> -> vector<64x32xf32>
    %cst_6 = arith.constant 0.000000e+00 : f32
    %11 = vector.broadcast %cst_6 : f32 to vector<8x32xf32>
    %12 = vector.extract_strided_slice %10 {offsets = [0, 0], sizes = [8, 32], strides = [1, 1]} : vector<64x32xf32> to vector<8x32xf32>
    %cst_7 = arith.constant dense<0.000000e+00> : vector<8x32xf32>
    %13 = tpu.matmul %11, %1, %cst_7 {dimension_numbers = #tpu.dot_dimension_numbers<[1], [0], [0], [1], [0, 0, 1, 1], [], []>} : vector<8x32xf32>, vector<32x32xf32>, vector<8x32xf32> -> vector<8x32xf32>
    %14 = arith.addf %12, %13 : vector<8x32xf32>
    %15 = math.tanh %14 : vector<8x32xf32>
    %16 = vector.extract_strided_slice %10 {offsets = [8, 0], sizes = [8, 32], strides = [1, 1]} : vector<64x32xf32> to vector<8x32xf32>
    %cst_8 = arith.constant dense<0.000000e+00> : vector<8x32xf32>
    %17 = tpu.matmul %15, %1, %cst_8 {dimension_numbers = #tpu.dot_dimension_numbers<[1], [0], [0], [1], [0, 0, 1, 1], [], []>} : vector<8x32xf32>, vector<32x32xf32>, vector<8x32xf32> -> vector<8x32xf32>
    %18 = arith.addf %16, %17 : vector<8x32xf32>
    %19 = math.tanh %18 : vector<8x32xf32>
    %20 = vector.extract_strided_slice %10 {offsets = [16, 0], sizes = [8, 32], strides = [1, 1]} : vector<64x32xf32> to vector<8x32xf32>
    %cst_9 = arith.constant dense<0.000000e+00> : vector<8x32xf32>
    %21 = tpu.matmul %19, %1, %cst_9 {dimension_numbers = #tpu.dot_dimension_numbers<[1], [0], [0], [1], [0, 0, 1, 1], [], []>} : vector<8x32xf32>, vector<32x32xf32>, vector<8x32xf32> -> vector<8x32xf32>
    %22 = arith.addf %20, %21 : vector<8x32xf32>
    %23 = math.tanh %22 : vector<8x32xf32>
    %24 = vector.extract_strided_slice %10 {offsets = [24, 0], sizes = [8, 32], strides = [1, 1]} : vector<64x32xf32> to vector<8x32xf32>
    %cst_10 = arith.constant dense<0.000000e+00> : vector<8x32xf32>
    %25 = tpu.matmul %23, %1, %cst_10 {dimension_numbers = #tpu.dot_dimension_numbers<[1], [0], [0], [1], [0, 0, 1, 1], [], []>} : vector<8x32xf32>, vector<32x32xf32>, vector<8x32xf32> -> vector<8x32xf32>
    %26 = arith.addf %24, %25 : vector<8x32xf32>
    %27 = math.tanh %26 : vector<8x32xf32>
    %28 = vector.extract_strided_slice %10 {offsets = [32, 0], sizes = [8, 32], strides = [1, 1]} : vector<64x32xf32> to vector<8x32xf32>
    %cst_11 = arith.constant dense<0.000000e+00> : vector<8x32xf32>
    %29 = tpu.matmul %27, %1, %cst_11 {dimension_numbers = #tpu.dot_dimension_numbers<[1], [0], [0], [1], [0, 0, 1, 1], [], []>} : vector<8x32xf32>, vector<32x32xf32>, vector<8x32xf32> -> vector<8x32xf32>
    %30 = arith.addf %28, %29 : vector<8x32xf32>
    %31 = math.tanh %30 : vector<8x32xf32>
    %32 = vector.extract_strided_slice %10 {offsets = [40, 0], sizes = [8, 32], strides = [1, 1]} : vector<64x32xf32> to vector<8x32xf32>
    %cst_12 = arith.constant dense<0.000000e+00> : vector<8x32xf32>
    %33 = tpu.matmul %31, %1, %cst_12 {dimension_numbers = #tpu.dot_dimension_numbers<[1], [0], [0], [1], [0, 0, 1, 1], [], []>} : vector<8x32xf32>, vector<32x32xf32>, vector<8x32xf32> -> vector<8x32xf32>
    %34 = arith.addf %32, %33 : vector<8x32xf32>
    %35 = math.tanh %34 : vector<8x32xf32>
    %36 = vector.extract_strided_slice %10 {offsets = [48, 0], sizes = [8, 32], strides = [1, 1]} : vector<64x32xf32> to vector<8x32xf32>
    %cst_13 = arith.constant dense<0.000000e+00> : vector<8x32xf32>
    %37 = tpu.matmul %35, %1, %cst_13 {dimension_numbers = #tpu.dot_dimension_numbers<[1], [0], [0], [1], [0, 0, 1, 1], [], []>} : vector<8x32xf32>, vector<32x32xf32>, vector<8x32xf32> -> vector<8x32xf32>
    %38 = arith.addf %36, %37 : vector<8x32xf32>
    %39 = math.tanh %38 : vector<8x32xf32>
    %40 = vector.extract_strided_slice %10 {offsets = [56, 0], sizes = [8, 32], strides = [1, 1]} : vector<64x32xf32> to vector<8x32xf32>
    %cst_14 = arith.constant dense<0.000000e+00> : vector<8x32xf32>
    %41 = tpu.matmul %39, %1, %cst_14 {dimension_numbers = #tpu.dot_dimension_numbers<[1], [0], [0], [1], [0, 0, 1, 1], [], []>} : vector<8x32xf32>, vector<32x32xf32>, vector<8x32xf32> -> vector<8x32xf32>
    %42 = arith.addf %40, %41 : vector<8x32xf32>
    %43 = math.tanh %42 : vector<8x32xf32>
    %cst_15 = arith.constant dense<0.000000e+00> : vector<8x32xf32>
    %44 = tpu.matmul %43, %2, %cst_15 {dimension_numbers = #tpu.dot_dimension_numbers<[1], [0], [0], [1], [0, 0, 1, 1], [], []>} : vector<8x32xf32>, vector<32x32xf32>, vector<8x32xf32> -> vector<8x32xf32>
    %45 = arith.addf %44, %3 : vector<8x32xf32>
    %46 = vector.extract_strided_slice %45 {offsets = [0, 0], sizes = [8, 8], strides = [1, 1]} : vector<8x32xf32> to vector<8x8xf32>
    %cst_16 = arith.constant dense<0xFF800000> : vector<8xf32>
    %47 = vector.multi_reduction <maximumf>, %46, %cst_16 [1] : vector<8x8xf32> to vector<8xf32>
    %48 = vector.shape_cast %47 : vector<8xf32> to vector<8x1xf32>
    %49 = vector.broadcast %48 : vector<8x1xf32> to vector<8x8xf32>
    %50 = arith.subf %46, %49 : vector<8x8xf32>
    %51 = math.exp %50 : vector<8x8xf32>
    %cst_17 = arith.constant dense<0.000000e+00> : vector<8xf32>
    %52 = vector.multi_reduction <add>, %51, %cst_17 [1] : vector<8x8xf32> to vector<8xf32>
    %53 = vector.shape_cast %52 : vector<8xf32> to vector<8x1xf32>
    %54 = vector.broadcast %53 : vector<8x1xf32> to vector<8x8xf32>
    %55 = arith.divf %51, %54 : vector<8x8xf32>
    %c0_18 = arith.constant 0 : index
    %c0_19 = arith.constant 0 : index
    %56 = vector.load %arg2[%c0_18, %c0_19] : memref<8x8xf32, #tpu.memory_space<vmem>>, vector<8x8xf32>
    tpu.vector_store %arg2[%c0_18, %c0_19], %55 {strides = array<i32>} : memref<8x8xf32, #tpu.memory_space<vmem>>, vector<8x8xf32>,
    return
  }
}

</mosaic_0001>

<bundles_post_ra>
// kernel: tpu_custom_call.1
= control target key start
LH: loop header
LB: loop body
LE: loop exit
PB: predicated region body
PF: predicated region fallthrough
CT: control target
= control target key end

     0   :  { %v1161_v2 = vmov 0   ;;  %v1162_v7 = vmov 0.0   ;;  %s1371_s0 = inlined_call_operand.vmem [shape: s32[64,1], index: 0, kind: input, shape index: {}]   ;;  %s1372_s1 = inlined_call_operand.vmem [shape: f32[104,32], index: 1, kind: input, shape index: {}]   ;;  %s1373_s2 = inlined_call_operand.hbm [shape: f32[8,8], index: 2, kind: output, shape index: {}]  }
   0x1   :  { %v25_v0 = vld [vmem:[%s1371_s0] sm:$0xff]  ;;  %v27_v1 = vld [vmem:[%s1371_s0 + $0x10] sm:$0xff]  ;;  %1117 = vset.pattern.permute.xlu0 %v1161_v2  ;;  %1118 = vset.pattern.permute.xlu1 %v1161_v2  ;;  %v15_v3 = vld [vmem:[%s1372_s1 + $0x18] sm:$0xff] }
   0x2   :  { %36 = vperm.xlu0 %1117, %v25_v0   ;;  %42 = vperm.xlu1 %1118, %v27_v1   ;;  %v1192_v4 = vld [vmem:[%s1372_s1 + $0x38] sm:$0xff]  ;;  %v26_v5 = vld [vmem:[%s1371_s0 + $0x8] sm:$0xff]  ;;  %v14_v8 = vld [vmem:[%s1372_s1 + $0x10] sm:$0xff] }
   0x3   :  { %v28_v6 = vld [vmem:[%s1371_s0 + $0x18] sm:$0xff]  ;;  %994 = vmatprep.subr.mxu0 %v15_v3  ;;  %1014 = vmatprep.subr.mxu1 %v1162_v7  ;;  %v1208_v9 = vld [vmem:[%s1372_s1 + $0x30] sm:$0xff]  ;;  %v13_v10 = vld [vmem:[%s1372_s1 + $0x8] sm:$0xff] }
   0x4   :  { %995 = vmatpush3.msra.mxu0 %v15_v3  ;;  %1015 = vmatpush3.msra.mxu1 %v1192_v4 }
   0x5   :  { %996 = vmatprep.subr.mxu0 %v14_v8  ;;  %1016 = vmatprep.subr.mxu1 %v1162_v7 }
   0x6   :  { %7 = vsyncpa [#allocation3], 0  ;;  %39 = vperm.xlu0 %1117, %v26_v5   ;;  %45 = vperm.xlu1 %1118, %v28_v6   ;;  %v1217_v11 = vld [vmem:[%s1372_s1 + $0x28] sm:$0xff]  ;;  %v29_v12 = vld [vmem:[%s1371_s0 + $0x20] sm:$0xff]  ;;  %vm1163_vm0 = vmmov 0   ;;  %v33_v17 = vlaneseq  ;;  %vm83_vm1 = vcmask 261120  }
   0x7   :  { %v30_v13 = vld [vmem:[%s1371_s0 + $0x28] sm:$0xff]  ;;  %997 = vmatpush3.msra.mxu0 %v14_v8  ;;  %1017 = vmatpush3.msra.mxu1 %v1208_v9  ;;  %v12_v14 = vld [vmem:[%s1372_s1] sm:$0xff]  ;;  %v31_v16 = vld [vmem:[%s1371_s0 + $0x30] sm:$0xff]  ;;  %vm886_vm10 = vcmask 64512   ;;  %s1164_s22 = smov [#allocation2]  }
   0x8   :  { %998 = vmatprep.subr.mxu0 %v13_v10  ;;  %1018 = vmatprep.subr.mxu1 %v1162_v7  ;;  %v1234_v15 = vld [vmem:[%s1372_s1 + $0x20] sm:$0xff]  ;;  %v34_v18 = vand.u32 127, %v33_v17  ;;  %v32_v35 = vld [vmem:[%s1371_s0 + $0x38] sm:$0xff]  ;;  %s905_s23 = sshll.u32 %s1164_s22, 4  ;;  %s906_s23 = int_to_ptr.vmem [resolvable:$true] %s905_s23 }
   0x9   :  { %999 = vmatpush3.msra.mxu0 %v13_v10  ;;  %1019 = vmatpush3.msra.mxu1 %v1217_v11  ;;  %v22_v10 = vld [vmem:[%s1372_s1 + $0x50] sm:$0xff]  ;;  %v24_v17 = vld [vmem:[%s1372_s1 + $0x60] sm:$0xff]  ;;  %p1144_p1 = scmp.lt.s32.totalorder %s906_s23, %s906_s23 }
   0xa   :  { %48 = vperm.xlu0 %1117, %v29_v12   ;;  %51 = vperm.xlu1 %1118, %v30_v13   ;;  %v20_v12 = vld [vmem:[%s1372_s1 + $0x40] sm:$0xff] }
   0xb   :  { %1000 = vmatprep.subr.mxu0 %v12_v14  ;;  %1020 = vmatprep.subr.mxu1 %v1162_v7 }
   0xc   :  { %1001 = vmatpush3.msra.mxu0 %v12_v14  ;;  %1021 = vmatpush3.msra.mxu1 %v1234_v15 }
   0xd   :  { %1022 = vmatprep.mubr.msk.f32.mxu1 %vm1163_vm0, %v1162_v7  ;;  %1025 = vmatprep.subr.mxu1 %v1162_v7 }
   0xe   :  { %54 = vperm.xlu0 %1117, %v31_v16   ;;  %1023 = vmatmul.mubr.f32.vlgmr.msra.gmra.mxu1 %v1162_v7 }
   0xf   :  { %1026 = vmatpush3.msra.mxu1 %v1192_v4  ;;  %1033 = vmatprep.mubr.msk.f32.mxu1 %vm1163_vm0, %v1162_v7 }
  0x10   :  { %1027 = vmatprep.subr.mxu1 %v1162_v7  ;;  %1036 = vmatprep.subr.mxu0 %v1162_v7 }
  0x11   :  { %1028 = vmatpush3.msra.mxu1 %v1208_v9  ;;  %57 = vperm.xlu1 %1118, %v32_v35  }
  0x12   :  { %1029 = vmatprep.subr.mxu1 %v1162_v7 }
  0x13   :  { %1030 = vmatpush3.msra.mxu1 %v1217_v11 }
  0x14   :  { %1031 = vmatprep.subr.mxu1 %v1162_v7 }
  0x15   :  { %1032 = vmatpush3.msra.mxu1 %v1234_v15 }
  0x16   :  { %1047 = vmatprep.subr.mxu1 %v1162_v7 }
  0x7d   :  { %v37_v19 = vpop.permute.xlu0 %36  ;;  %v43_v20 = vpop.permute.xlu1 %42 }
  0x7e   :  { %vm59_vm2 = vcmp.eq.s32.totalorder %v34_v18, %v37_v19  ;;  %vm61_vm3 = vcmp.eq.s32.totalorder %v34_v18, %v43_v20 }
  0x7f   :  { %v913_v21 = vsel %vm59_vm2, 1.0, %v1162_v7  ;;  %v915_v24 = vsel %vm61_vm3, 1.0, %v1162_v7 }
  0x80   :  { %1002 = vmatprep.mubr.msk.f32.mxu0 %vm83_vm1, %v913_v21 }
  0x81   :  { %v40_v22 = vpop.permute.xlu0 %39  ;;  %v46_v23 = vpop.permute.xlu1 %45 }
  0x82   :  { %vm60_vm4 = vcmp.eq.s32.totalorder %v34_v18, %v40_v22  ;;  %vm62_vm5 = vcmp.eq.s32.totalorder %v34_v18, %v46_v23 }
  0x83   :  { %v914_v25 = vsel %vm60_vm4, 1.0, %v1162_v7  ;;  %v916_v26 = vsel %vm62_vm5, 1.0, %v1162_v7 }
  0x84   :  { %1003 = vmatmul.mubr.msk.f32.vlgmr.msra.gmra.mxu0 %vm83_vm1, %v914_v25 }
  0x85   :  { %v49_v27 = vpop.permute.xlu0 %48  ;;  %1005 = vmatprep.mubr.msk.f32.mxu0 %vm83_vm1, %v915_v24  ;;  %v52_v28 = vpop.permute.xlu1 %51  ;;  %1037 = vmatpush3.msra.mxu0 %v1192_v4 }
  0x86   :  { %vm63_vm6 = vcmp.eq.s32.totalorder %v34_v18, %v49_v27  ;;  %vm64_vm7 = vcmp.eq.s32.totalorder %v34_v18, %v52_v28  ;;  %1038 = vmatprep.subr.mxu0 %v1162_v7 }
  0x87   :  { %v917_v29 = vsel %vm63_vm6, 1.0, %v1162_v7  ;;  %1039 = vmatpush3.msra.mxu0 %v1208_v9  ;;  %v918_v30 = vsel %vm64_vm7, 1.0, %v1162_v7 }
  0x88   :  { %1006 = vmatmul.mubr.msk.f32.gmra.mxu0 %vm83_vm1, %v916_v26  ;;  %1040 = vmatprep.subr.mxu0 %v1162_v7 }
  0x89   :  { %v55_v31 = vpop.permute.xlu0 %54  ;;  %1008 = vmatprep.mubr.msk.f32.mxu0 %vm83_vm1, %v917_v29  ;;  %1041 = vmatpush3.msra.mxu0 %v1217_v11 }
  0x8a   :  { %vm65_vm8 = vcmp.eq.s32.totalorder %v34_v18, %v55_v31  ;;  %1042 = vmatprep.subr.mxu0 %v1162_v7 }
  0x8b   :  { %v919_v32 = vsel %vm65_vm8, 1.0, %v1162_v7  ;;  %1043 = vmatpush3.msra.mxu0 %v1234_v15 }
  0x8c   :  { %1009 = vmatmul.mubr.msk.f32.gmra.mxu0 %vm83_vm1, %v918_v30  ;;  %1058 = vmatprep.subr.mxu0 %v1162_v7  ;;  %v58_v39 = vpop.permute.xlu1 %57 }
  0x8d   :  { %1011 = vmatprep.mubr.msk.f32.mxu0 %vm83_vm1, %v919_v32  ;;  %vm66_vm9 = vcmp.eq.s32.totalorder %v34_v18, %v58_v39 }
  0x8e   :  { %v920_v40 = vsel %vm66_vm9, 1.0, %v1162_v7 }
  0x90   :  { %1012 = vmatmul.mubr.msk.f32.gmra.mxu0 %vm83_vm1, %v920_v40 }
  0x91   :  { %1044 = vmatprep.mubr.msk.f32.mxu0 %vm1163_vm0, %v1162_v7 }
  0xce   :  { %v282_v33 = vpop.f32.mrf.mxu1 }
  0xd0   :  { %v1024_v34 = vpop.f32.mrf.mxu1 }
 0x144   :  { %v1004_v36 = vpop.f32.mrf.mxu0 }
 0x146   :  { %v174_v37 = vpop.f32.mrf.mxu0 }
 0x147   :  { %v286_v38 = vadd.f32 %v282_v33, %v174_v37 }
 0x148   :  { %v1007_v46 = vpop.f32.mrf.mxu0 }
 0x149   :  { %1119 = vtanh.f32 %v286_v38 }
 0x14a   :  { %v184_v47 = vpop.f32.mrf.mxu0 }
 0x14c   :  { %v1010_v48 = vpop.f32.mrf.mxu0 }
 0x14e   :  { %v194_v49 = vpop.f32.mrf.mxu0 }
 0x150   :  { %v1307_v50 = vpop.f32.mrf.mxu0 }
 0x152   :  { %v204_v51 = vpop.f32.mrf.mxu0 }
 0x156   :  { %v1120_v41 = vpop.eup %1119 }
 0x157   :  { %1034 = vmatmul.mubr.msk.f32.vlgmr.msra.gmra.mxu1 %vm83_vm1, %v1120_v41 }
 0x158   :  { %1048 = vmatpush3.msra.mxu1 %v1192_v4  ;;  %1055 = vmatprep.mubr.msk.f32.mxu1 %vm1163_vm0, %v1162_v7 }
 0x159   :  { %1049 = vmatprep.subr.mxu1 %v1162_v7 }
 0x15a   :  { %1050 = vmatpush3.msra.mxu1 %v1208_v9 }
 0x15b   :  { %1051 = vmatprep.subr.mxu1 %v1162_v7 }
 0x15c   :  { %1052 = vmatpush3.msra.mxu1 %v1217_v11 }
 0x15d   :  { %1053 = vmatprep.subr.mxu1 %v1162_v7 }
 0x15e   :  { %1054 = vmatpush3.msra.mxu1 %v1234_v15 }
 0x15f   :  { %1069 = vmatprep.subr.mxu1 %v1162_v7 }
 0x217   :  { %v357_v42 = vpop.f32.mrf.mxu1 }
 0x218   :  { %v361_v43 = vadd.f32 %v1004_v36, %v357_v42 }
 0x219   :  { %v1035_v44 = vpop.f32.mrf.mxu1 }
 0x21a   :  { %1121 = vtanh.f32 %v361_v43 }
 0x227   :  { %v1122_v45 = vpop.eup %1121 }
 0x228   :  { %1045 = vmatmul.mubr.msk.f32.vlgmr.msra.gmra.mxu0 %vm83_vm1, %v1122_v45 }
 0x229   :  { %1059 = vmatpush3.msra.mxu0 %v1192_v4  ;;  %1066 = vmatprep.mubr.msk.f32.mxu0 %vm1163_vm0, %v1162_v7 }
 0x22a   :  { %1060 = vmatprep.subr.mxu0 %v1162_v7 }
 0x22b   :  { %1061 = vmatpush3.msra.mxu0 %v1208_v9 }
 0x22c   :  { %1062 = vmatprep.subr.mxu0 %v1162_v7 }
 0x22d   :  { %1063 = vmatpush3.msra.mxu0 %v1217_v11 }
 0x22e   :  { %1064 = vmatprep.subr.mxu0 %v1162_v7 }
 0x22f   :  { %1065 = vmatpush3.msra.mxu0 %v1234_v15 }
 0x230   :  { %1080 = vmatprep.subr.mxu0 %v1162_v7 }
 0x2e8   :  { %v432_v52 = vpop.f32.mrf.mxu0 }
 0x2e9   :  { %v436_v53 = vadd.f32 %v432_v52, %v184_v47 }
 0x2ea   :  { %v1046_v54 = vpop.f32.mrf.mxu0 }
 0x2eb   :  { %1123 = vtanh.f32 %v436_v53 }
 0x2f8   :  { %v1124_v55 = vpop.eup %1123 }
 0x2f9   :  { %1056 = vmatmul.mubr.msk.f32.vlgmr.msra.gmra.mxu1 %vm83_vm1, %v1124_v55 }
 0x2fa   :  { %1070 = vmatpush3.msra.mxu1 %v1192_v4  ;;  %1077 = vmatprep.mubr.msk.f32.mxu1 %vm1163_vm0, %v1162_v7 }
 0x2fb   :  { %1071 = vmatprep.subr.mxu1 %v1162_v7 }
 0x2fc   :  { %1072 = vmatpush3.msra.mxu1 %v1208_v9 }
 0x2fd   :  { %1073 = vmatprep.subr.mxu1 %v1162_v7 }
 0x2fe   :  { %1074 = vmatpush3.msra.mxu1 %v1217_v11 }
 0x2ff   :  { %1075 = vmatprep.subr.mxu1 %v1162_v7 }
 0x300   :  { %1076 = vmatpush3.msra.mxu1 %v1234_v15 }
 0x301   :  { %1091 = vmatprep.subr.mxu1 %v1162_v7 }
 0x3b9   :  { %v507_v56 = vpop.f32.mrf.mxu1 }
 0x3ba   :  { %v511_v57 = vadd.f32 %v1007_v46, %v507_v56 }
 0x3bb   :  { %v1057_v58 = vpop.f32.mrf.mxu1 }
 0x3bc   :  { %1125 = vtanh.f32 %v511_v57 }
 0x3c9   :  { %v1126_v59 = vpop.eup %1125 }
 0x3ca   :  { %1067 = vmatmul.mubr.msk.f32.vlgmr.msra.gmra.mxu0 %vm83_vm1, %v1126_v59 }
 0x3cb   :  { %1081 = vmatpush3.msra.mxu0 %v1192_v4  ;;  %1088 = vmatprep.mubr.msk.f32.mxu0 %vm1163_vm0, %v1162_v7 }
 0x3cc   :  { %1082 = vmatprep.subr.mxu0 %v1162_v7 }
 0x3cd   :  { %1083 = vmatpush3.msra.mxu0 %v1208_v9 }
 0x3ce   :  { %1084 = vmatprep.subr.mxu0 %v1162_v7 }
 0x3cf   :  { %1085 = vmatpush3.msra.mxu0 %v1217_v11 }
 0x3d0   :  { %1086 = vmatprep.subr.mxu0 %v1162_v7 }
 0x3d1   :  { %1087 = vmatpush3.msra.mxu0 %v1234_v15 }
 0x3d2   :  { %1102 = vmatprep.subr.mxu0 %v1162_v7 }
 0x48a   :  { %v582_v60 = vpop.f32.mrf.mxu0 }
 0x48b   :  { %v586_v61 = vadd.f32 %v582_v60, %v194_v49 }
 0x48c   :  { %v1068_v62 = vpop.f32.mrf.mxu0 }
 0x48d   :  { %1127 = vtanh.f32 %v586_v61 }
 0x49a   :  { %v1128_v63 = vpop.eup %1127 }
 0x49b   :  { %1078 = vmatmul.mubr.msk.f32.vlgmr.msra.gmra.mxu1 %vm83_vm1, %v1128_v63 }
 0x49c   :  { %1092 = vmatpush3.msra.mxu1 %v1192_v4  ;;  %1099 = vmatprep.mubr.msk.f32.mxu1 %vm1163_vm0, %v1162_v7 }
 0x49d   :  { %1093 = vmatprep.subr.mxu1 %v1162_v7 }
 0x49e   :  { %1094 = vmatpush3.msra.mxu1 %v1208_v9  ;;  %v23_v9 = vld [vmem:[%s1372_s1 + $0x58] sm:$0xff] }
 0x49f   :  { %1095 = vmatprep.subr.mxu1 %v1162_v7 }
 0x4a0   :  { %1096 = vmatpush3.msra.mxu1 %v1217_v11  ;;  %v21_v11 = vld [vmem:[%s1372_s1 + $0x48] sm:$0xff]  ;;  %s1139_s1 = scalar_lea.vmem %s906_s23, 128 }
 0x4a1   :  { %1097 = vmatprep.subr.mxu1 %v1162_v7  ;;  %p1140_p0 = scmp.ne.s32.totalorder %s906_s23, %s1139_s1  ;;  %p1145_p2 = scmp.lt.s32.totalorder %s1139_s1, %s1139_s1 }
 0x4a2   :  { %1098 = vmatpush3.msra.mxu1 %v1234_v15 }
 0x4a3   :  { %p1146_p3 = por %p1145_p2, %p1144_p1 }
 0x4a5   :  { %p1147_p4 = pnand %p1146_p3, %p1140_p0 }
 0x55b   :  { %v657_v0 = vpop.f32.mrf.mxu1 }
 0x55c   :  { %v661_v1 = vadd.f32 %v1010_v48, %v657_v0 }
 0x55d   :  { %v1079_v2 = vpop.f32.mrf.mxu1 }
 0x55e   :  { %1129 = vtanh.f32 %v661_v1 }
 0x56b   :  { %v1130_v3 = vpop.eup %1129 }
 0x56c   :  { %1089 = vmatmul.mubr.msk.f32.vlgmr.msra.gmra.mxu0 %vm83_vm1, %v1130_v3 }
 0x56d   :  { %1110 = vmatprep.mubr.msk.f32.mxu0 %vm1163_vm0, %v1162_v7  ;;  %1103 = vmatpush3.msra.mxu0 %v23_v9 }
 0x56e   :  { %1104 = vmatprep.subr.mxu0 %v1162_v7 }
 0x56f   :  { %1105 = vmatpush3.msra.mxu0 %v22_v10 }
 0x570   :  { %1106 = vmatprep.subr.mxu0 %v1162_v7 }
 0x571   :  { %1107 = vmatpush3.msra.mxu0 %v21_v11 }
 0x572   :  { %1108 = vmatprep.subr.mxu0 %v1162_v7 }
 0x573   :  { %1109 = vmatpush3.msra.mxu0 %v20_v12 }
 0x62c   :  { %v732_v4 = vpop.f32.mrf.mxu0 }
 0x62d   :  { %v736_v5 = vadd.f32 %v732_v4, %v204_v51 }
 0x62e   :  { %v1090_v6 = vpop.f32.mrf.mxu0 }
 0x62f   :  { %1131 = vtanh.f32 %v736_v5 }
 0x63c   :  { %v1132_v8 = vpop.eup %1131 }
 0x63d   :  { %1100 = vmatmul.mubr.msk.f32.vlgmr.msra.gmra.mxu1 %vm83_vm1, %v1132_v8 }
 0x6fd   :  { %v807_v13 = vpop.f32.mrf.mxu1 }
 0x6fe   :  { %v811_v14 = vadd.f32 %v1307_v50, %v807_v13 }
 0x6ff   :  { %v1101_v15 = vpop.f32.mrf.mxu1 }
 0x700   :  { %1133 = vtanh.f32 %v811_v14 }
 0x70d   :  { %v1134_v16 = vpop.eup %1133 }
 0x70e   :  { %1111 = vmatmul.mubr.msk.f32.vlgmr.msra.gmra.mxu0 %vm83_vm1, %v1134_v16 }
 0x7ce   :  { %v882_v18 = vpop.f32.mrf.mxu0 }
 0x7cf   :  { %v883_v19 = vadd.f32 %v882_v18, %v24_v17 }
 0x7d0   :  { %v1112_v20 = vpop.f32.mrf.mxu0 }
 0x7d1   :  { %v887_v21 = vsel %vm886_vm10, %v883_v19, -inf }
 0x7d2   :  { %888 = vmax.xlane.f32.xlu0 %v887_v21 }
 0x85b   :  { %v889_v7 = vpop.xlane.xlu0 %888 }
 0x85c   :  { %v890_v22 = vsub.f32 %v883_v19, %v889_v7 }
 0x85e   :  { %v891_v23 = vmul.f32 1.442695, %v890_v22 }
 0x860   :  { %1135 = vpow2.f32 %v891_v23 }
 0x86d   :  { %v1136_v24 = vpop.eup %1135 }
 0x86e   :  { %v893_v25 = vsel %vm886_vm10, %v1136_v24, 0.0 }
 0x86f   :  { %894 = vadd.xlane.f32.xlu1 %v893_v25 }
 0x8f8   :  { %v895_v26 = vpop.xlane.xlu1 %894 }
 0x8f9   :  { %1137 = vrcp.f32 %v895_v26 }
 0x906   :  { %v1138_v27 = vpop.eup %1137 }
 0x907   :  { %v897_v28 = vmul.f32 %v1138_v27, %v1136_v24 }
 0x909   :  { %898 = vst.msk [vmem:[#allocation2] sm:$0xff] %vm886_vm10, %v897_v28 }
 0x90a   :  { %1150 = shalt.err (!%p1147_p4)
}
 0x90b   :  { %908 = dma.vmem_to_hbm [thread:$0]  %s906_s23, 128, %s1373_s2, [#allocation3]  }
 0x90c   :  { %1159 = dma.done.wait [#allocation3], 128  }
 0x90d   :  { %1160 = vsyncadd [#allocation3], 4294967168 }
 0x90e   :  { %912 = vsyncpa [#allocation3], 1 }

</bundles_post_ra>
